<compile_context>
chip_gen: v7x
topology: tpu7x:2x2x1
jax: 0.10.0
libtpu: 0.0.40
codegen_flags: <defaults>
</compile_context>

<pallas_src>
import functools
import math

import jax
import jax.numpy as jnp
from jax.experimental import pallas as pl
from jax.experimental.pallas import tpu as pltpu

# Explicit scoped-VMEM limits (flash tiling keeps per-step footprints tiny, so
# 32 MiB is safe on v5e/v6e/v7x; sweep upward on v5e/v6e for bigger tiles).
_ATTN_VMEM_BYTES = 32 * 1024 * 1024
_LINEAR_VMEM_BYTES = 32 * 1024 * 1024


# ----------------------------------------------------------------------------
# Tiled linear projection: y = x @ w_kn  (w pre-transposed to (K, N) at load).
# ----------------------------------------------------------------------------
def _linear_kernel(x_ref, w_ref, o_ref, acc_ref):
    @pl.when(pl.program_id(2) == 0)
    def _():
        acc_ref[...] = jnp.zeros_like(acc_ref)

    acc_ref[...] += jnp.dot(x_ref[...], w_ref[...],
                            preferred_element_type=jnp.float32)

    @pl.when(pl.program_id(2) == pl.num_programs(2) - 1)
    def _():
        o_ref[...] = acc_ref[...].astype(o_ref.dtype)


def _round_up(n, m):
    return ((n + m - 1) // m) * m


def pallas_linear(x, w_kn, *, out_dtype=None, tm=256, tn=256, tk=512):
    """x: (M, K); w_kn: (K, N) (torch weight transposed once at load time)."""
    M, K = x.shape
    K2, N = w_kn.shape
    assert K == K2
    out_dtype = out_dtype or x.dtype
    tm, tn, tk = min(tm, M), min(tn, N), min(tk, K)
    Mp, Np, Kp = _round_up(M, tm), _round_up(N, tn), _round_up(K, tk)
    if Mp != M or Kp != K:
        x = jnp.pad(x, ((0, Mp - M), (0, Kp - K)))
    if Kp != K or Np != N:
        w_kn = jnp.pad(w_kn, ((0, Kp - K), (0, Np - N)))

    grid = (Mp // tm, Np // tn, Kp // tk)
    y = pl.pallas_call(
        _linear_kernel,
        out_shape=jax.ShapeDtypeStruct((Mp, Np), out_dtype),
        grid=grid,
        in_specs=[
            pl.BlockSpec((tm, tk), lambda i, j, k: (i, k)),
            pl.BlockSpec((tk, tn), lambda i, j, k: (k, j)),
        ],
        out_specs=pl.BlockSpec((tm, tn), lambda i, j, k: (i, j)),
        scratch_shapes=[pltpu.VMEM((tm, tn), jnp.float32)],
        compiler_params=pltpu.CompilerParams(
            dimension_semantics=("parallel", "parallel", "arbitrary"),
            vmem_limit_bytes=_LINEAR_VMEM_BYTES,
        ),
    )(x, w_kn)
    if Mp != M or Np != N:
        y = y[:M, :N]
    return y


# ----------------------------------------------------------------------------
# Flash attention core: grid (B, H, q_tiles, kv_tiles), kv last ("arbitrary").
# Blocks: q (tq, Dh), k/v (tk, Dh); scratch m/l (tq, 1) and acc/qs (tq, Dh).
# ----------------------------------------------------------------------------
def _flash_attn_kernel(*refs, has_rope, has_mask, mxu_dtype, scale, use_approx):
    q_ref, k_ref, v_ref = refs[0], refs[1], refs[2]
    pos = 3
    if has_rope:
        cq_ref, sq_ref, ck_ref, sk_ref = refs[3:7]
        pos = 7
    if has_mask:
        mask_ref = refs[pos]
        pos += 1
    o_ref = refs[pos]
    m_ref, l_ref, acc_ref, qs_ref = refs[pos + 1:pos + 5]

    ki = pl.program_id(3)
    dh = q_ref.shape[-1]

    @pl.when(ki == 0)
    def _init():
        m_ref[...] = jnp.full(m_ref.shape, -jnp.inf, dtype=m_ref.dtype)
        l_ref[...] = jnp.zeros(l_ref.shape, dtype=l_ref.dtype)
        acc_ref[...] = jnp.zeros(acc_ref.shape, dtype=acc_ref.dtype)
        if has_rope:
            qf = q_ref[...].astype(jnp.float32)
            # De-interleaved ("rotate-half") RoPE; 1/sqrt(Dh) folded into cq/sq.
            qs_ref[...] = (qf * cq_ref[...]
                           + pltpu.roll(qf, shift=dh // 2, axis=1) * sq_ref[...])
        else:
            qs_ref[...] = q_ref[...].astype(jnp.float32) * scale

    if has_rope:
        kf = k_ref[...].astype(jnp.float32)
        kf = kf * ck_ref[...] + pltpu.roll(kf, shift=dh // 2, axis=1) * sk_ref[...]
        kb = kf.astype(mxu_dtype)
    else:
        kb = k_ref[...]

    # (tq, Dh) x (tk, Dh) -> (tq, tk); K consumed untransposed, f32 accumulate.
    s = jax.lax.dot_general(
        qs_ref[...].astype(mxu_dtype), kb,
        dimension_numbers=(((1,), (1,)), ((), ())),
        preferred_element_type=jnp.float32)
    if has_mask:
        s = s + mask_ref[...]

    # Online softmax update (f32).
    m_prev = m_ref[...]
    m_new = jnp.maximum(m_prev, jnp.max(s, axis=-1, keepdims=True))
    alpha = jnp.exp(m_prev - m_new)
    p = jnp.exp(s - m_new)
    l_ref[...] = alpha * l_ref[...] + jnp.sum(p, axis=-1, keepdims=True)
    acc_ref[...] = alpha * acc_ref[...] + jax.lax.dot_general(
        p.astype(mxu_dtype), v_ref[...],
        dimension_numbers=(((1,), (0,)), ((), ())),
        preferred_element_type=jnp.float32)
    m_ref[...] = m_new

    @pl.when(ki == pl.num_programs(3) - 1)
    def _finalize():
        o_ref[...] = (acc_ref[...]
                      * pl.reciprocal(l_ref[...], approx=use_approx)
                      ).astype(o_ref.dtype)


def _pick_block(total, want):
    b = min(want, total)
    if total % b != 0:
        # TODO(synk): pad ragged sequence lengths instead of a full-extent block.
        b = total
    return b


def flash_attention(xq, xk, xv, cos_q=None, sin_q=None, cos_k=None, sin_k=None,
                    mask=None, *, scale, mxu_dtype, use_approx,
                    block_q=256, block_kv=512):
    """xq: (B, H, S, Dh); xk/xv: (B, H, Ck, Dh); mask: (S, Ck) or None."""
    B, H, S, Dh = xq.shape
    Ck = xk.shape[2]
    has_rope = cos_q is not None
    has_mask = mask is not None
    tq = _pick_block(S, block_q)
    tk = _pick_block(Ck, block_kv)
    grid = (B, H, S // tq, Ck // tk)

    in_specs = [
        pl.BlockSpec((None, None, tq, Dh), lambda b, h, qi, ki: (b, h, qi, 0)),
        pl.BlockSpec((None, None, tk, Dh), lambda b, h, qi, ki: (b, h, ki, 0)),
        pl.BlockSpec((None, None, tk, Dh), lambda b, h, qi, ki: (b, h, ki, 0)),
    ]
    args = [xq, xk, xv]
    if has_rope:
        in_specs += [
            pl.BlockSpec((tq, Dh), lambda b, h, qi, ki: (qi, 0)),
            pl.BlockSpec((tq, Dh), lambda b, h, qi, ki: (qi, 0)),
            pl.BlockSpec((tk, Dh), lambda b, h, qi, ki: (ki, 0)),
            pl.BlockSpec((tk, Dh), lambda b, h, qi, ki: (ki, 0)),
        ]
        args += [cos_q, sin_q, cos_k, sin_k]
    if has_mask:
        in_specs.append(pl.BlockSpec((tq, tk), lambda b, h, qi, ki: (qi, ki)))
        args.append(mask)

    kernel = functools.partial(
        _flash_attn_kernel, has_rope=has_rope, has_mask=has_mask,
        mxu_dtype=mxu_dtype, scale=scale, use_approx=use_approx)

    return pl.pallas_call(
        kernel,
        out_shape=jax.ShapeDtypeStruct((B, H, S, Dh), xq.dtype),
        grid=grid,
        in_specs=in_specs,
        out_specs=pl.BlockSpec((None, None, tq, Dh),
                               lambda b, h, qi, ki: (b, h, qi, 0)),
        scratch_shapes=[
            pltpu.VMEM((tq, 1), jnp.float32),    # running max
            pltpu.VMEM((tq, 1), jnp.float32),    # running denom
            pltpu.VMEM((tq, Dh), jnp.float32),   # output accumulator
            pltpu.VMEM((tq, Dh), jnp.float32),   # roped+scaled q (cached at ki==0)
        ],
        compiler_params=pltpu.CompilerParams(
            dimension_semantics=("parallel", "parallel", "parallel", "arbitrary"),
            vmem_limit_bytes=_ATTN_VMEM_BYTES,
        ),
    )(*args)


# ----------------------------------------------------------------------------
# One-time (parameter-load time) weight preparation.
# ----------------------------------------------------------------------------
def prepare_params(params, nheads, *, use_rope, dtype):
    """Permute wq/wk rows per head into the de-interleaved RoPE layout (only
    when RoPE is used, applied exactly once), transpose all Linear weights from
    torch (out, in) to (in, out), and cast to the streaming/MXU dtype."""
    wq, wk, wv, wo = params["wq"], params["wk"], params["wv"], params["wo"]
    if use_rope:
        d = wq.shape[0]
        dh = d // nheads
        even = 2 * jnp.arange(dh // 2)
        perm_head = jnp.concatenate([even, even + 1])          # [0,2,...,1,3,...]
        perm = (jnp.arange(nheads)[:, None] * dh + perm_head[None, :]).reshape(-1)
        wq = wq[perm]
        wk = wk[perm]
    return {
        "wq": wq.T.astype(dtype),
        "wk": wk.T.astype(dtype),
        "wv": wv.T.astype(dtype),
        "wo": wo.T.astype(dtype),
    }


# ----------------------------------------------------------------------------
# Module forward (glue in plain JAX; hot paths in Pallas kernels above).
# ----------------------------------------------------------------------------
def attention_forward(prep, q, k, v, nheads, freqs_cis=None, mask=None, *,
                      mxu_dtype=jnp.bfloat16, block_q=256, block_kv=512):
    S, B, D = q.shape
    Ck = k.shape[0]
    Dh = D // nheads
    scale = 1.0 / math.sqrt(Dh)
    stream = mxu_dtype                      # bf16 streaming in production
    use_approx = (mxu_dtype == jnp.bfloat16)

    # Projections on (tokens, D) rows; outputs emitted directly in stream dtype.
    xq = pallas_linear(q.reshape(S * B, D).astype(stream), prep["wq"], out_dtype=stream)
    xk = pallas_linear(k.reshape(Ck * B, D).astype(stream), prep["wk"], out_dtype=stream)
    xv = pallas_linear(v.reshape(Ck * B, D).astype(stream), prep["wv"], out_dtype=stream)

    # (L*B, D) -> (B, H, L, Dh) for the per-(batch, head) flash grid.
    xq = xq.reshape(S, B, nheads, Dh).transpose(1, 2, 0, 3)
    xk = xk.reshape(Ck, B, nheads, Dh).transpose(1, 2, 0, 3)
    xv = xv.reshape(Ck, B, nheads, Dh).transpose(1, 2, 0, 3)

    if freqs_cis is not None:
        # De-interleaved tables; q-side carries the 1/sqrt(Dh) scale.
        cos = jnp.concatenate([freqs_cis[..., 0], freqs_cis[..., 0]], axis=-1)
        sin = jnp.concatenate([-freqs_cis[..., 1], freqs_cis[..., 1]], axis=-1)
        cos_q = (cos[:S] * scale).astype(jnp.float32)
        sin_q = (sin[:S] * scale).astype(jnp.float32)
        cos_k = cos[:Ck].astype(jnp.float32)
        sin_k = sin[:Ck].astype(jnp.float32)
    else:
        cos_q = sin_q = cos_k = sin_k = None

    mask2d = None if mask is None else mask.astype(jnp.float32)

    out = flash_attention(xq, xk, xv, cos_q, sin_q, cos_k, sin_k, mask2d,
                          scale=scale, mxu_dtype=mxu_dtype, use_approx=use_approx,
                          block_q=block_q, block_kv=block_kv)

    # (B, H, S, Dh) -> (S*B, D) rows so the wo output is already (S, B, D).
    out = out.transpose(2, 0, 1, 3).reshape(S * B, D)
    y = pallas_linear(out, prep["wo"], out_dtype=jnp.float32)
    return y.reshape(S, B, D)


# ----------------------------------------------------------------------------
# Pure-JAX reference (mirrors the PyTorch forward exactly) for verification.
# ----------------------------------------------------------------------------
def attention_reference(params, q, k, v, nheads, freqs_cis=None, mask=None):
    S, B, D = q.shape
    Ck = k.shape[0]
    Dh = D // nheads
    hp = jax.lax.Precision.HIGHEST

    xq = jnp.einsum("sbd,nd->sbn", q, params["wq"], precision=hp).reshape(S, B, nheads, Dh)
    xk = jnp.einsum("sbd,nd->sbn", k, params["wk"], precision=hp).reshape(Ck, B, nheads, Dh)
    xv = jnp.einsum("sbd,nd->sbn", v, params["wv"], precision=hp).reshape(Ck, B, nheads, Dh)

    if freqs_cis is not None:
        def rope(x, f):
            L = x.shape[0]
            x_ = x.reshape(*x.shape[:-1], Dh // 2, 2)
            fr = f[:L].reshape(L, 1, 1, Dh // 2, 2)
            o0 = x_[..., 0] * fr[..., 0] - x_[..., 1] * fr[..., 1]
            o1 = x_[..., 1] * fr[..., 0] + x_[..., 0] * fr[..., 1]
            return jnp.stack([o0, o1], axis=-1).reshape(x.shape)
        xq = rope(xq, freqs_cis)
        xk = rope(xk, freqs_cis)

    xq = xq.transpose(1, 2, 0, 3)
    xk = xk.transpose(1, 2, 0, 3)
    xv = xv.transpose(1, 2, 0, 3)

    scores = jnp.einsum("bhqd,bhkd->bhqk", xq, xk, precision=hp) / math.sqrt(Dh)
    if mask is not None:
        scores = scores + mask
    p = jax.nn.softmax(scores.astype(jnp.float32), axis=-1)
    out = jnp.einsum("bhqk,bhkd->bhqd", p, xv, precision=hp)
    out = out.transpose(2, 0, 1, 3).reshape(S, B, nheads * Dh)
    return jnp.einsum("sbd,nd->sbn", out, params["wo"], precision=hp)


if __name__ == "__main__":
    d_model, nheads = 32, 4
    head_dim = d_model // nheads
    seqlen, cond_len, bs = 8, 16, 2

    key = jax.random.PRNGKey(0)
    kq, kk, kv, ko, kx1, kx2, kx3, km = jax.random.split(key, 8)
    bound = 1.0 / math.sqrt(d_model)
    params = {
        "wq": jax.random.uniform(kq, (d_model, d_model), jnp.float32, -bound, bound),
        "wk": jax.random.uniform(kk, (d_model, d_model), jnp.float32, -bound, bound),
        "wv": jax.random.uniform(kv, (d_model, d_model), jnp.float32, -bound, bound),
        "wo": jax.random.uniform(ko, (d_model, d_model), jnp.float32, -bound, bound),
    }

    q = jax.random.normal(kx1, (seqlen, bs, d_model), jnp.float32)
    k = jax.random.normal(kx2, (cond_len, bs, d_model), jnp.float32)
    v = jax.random.normal(kx3, (cond_len, bs, d_model), jnp.float32)

    # freqs_cis stored as real (cos, sin) pairs: (max_len, head_dim//2, 2)
    max_len = max(seqlen, cond_len)
    inv_freq = 1.0 / (10000.0 ** (jnp.arange(0, head_dim, 2, dtype=jnp.float32) / head_dim))
    angles = jnp.arange(max_len, dtype=jnp.float32)[:, None] * inv_freq[None, :]
    freqs_cis = jnp.stack([jnp.cos(angles), jnp.sin(angles)], axis=-1)

    # small additive mask (broadcast over batch and heads)
    mask = 0.1 * jax.random.normal(km, (seqlen, cond_len), jnp.float32)

    ref = attention_reference(params, q, k, v, nheads, freqs_cis=freqs_cis, mask=mask)

    # f32 path: f32 streaming + f32 MXU accumulation, exact softmax reciprocal.
    prep_f32 = prepare_params(params, nheads, use_rope=True, dtype=jnp.float32)
    out_f32 = attention_forward(prep_f32, q, k, v, nheads, freqs_cis=freqs_cis,
                                mask=mask, mxu_dtype=jnp.float32)
    out_f32 = jax.block_until_ready(out_f32)
    assert out_f32.shape == (seqlen, bs, d_model)
    err_f32 = float(jnp.max(jnp.abs(out_f32 - ref)))
    assert err_f32 < 5e-2, err_f32

    # Production path: bf16 streaming + bf16 MXU operands, f32 accumulation,
    # approx softmax reciprocal (documented: slightly perturbs normalization).
    prep_bf16 = prepare_params(params, nheads, use_rope=True, dtype=jnp.bfloat16)
    out_bf16 = attention_forward(prep_bf16, q, k, v, nheads, freqs_cis=freqs_cis,
                                 mask=mask, mxu_dtype=jnp.bfloat16)
    out_bf16 = jax.block_until_ready(out_bf16)
    err_bf16 = float(jnp.max(jnp.abs(out_bf16 - ref)))
    assert err_bf16 < 0.25, err_bf16

    # Rope-free / mask-free kernel variant (no dummy tables or zero mask streamed).
    prep_plain = prepare_params(params, nheads, use_rope=False, dtype=jnp.float32)
    out_plain = attention_forward(prep_plain, q, k, v, nheads, mxu_dtype=jnp.float32)
    out_plain = jax.block_until_ready(out_plain)
    ref_plain = attention_reference(params, q, k, v, nheads)
    err_plain = float(jnp.max(jnp.abs(out_plain - ref_plain)))
    assert err_plain < 5e-2, err_plain

    print("KERNEL_OK")
</pallas_src>

<mosaic_0001>
module attributes {stable_mosaic.version = 11 : i64} {
  func.func @_linear_kernel(%arg0: i32, %arg1: i32, %arg2: i32, %arg3: memref<16x32xf32, #tpu.memory_space<vmem>>, %arg4: memref<32x32xf32, #tpu.memory_space<vmem>>, %arg5: memref<16x32xf32, #tpu.memory_space<vmem>>, %arg6: memref<16x32xf32, #tpu.memory_space<vmem>>) attributes {dimension_semantics = [#tpu.dimension_semantics<parallel>, #tpu.dimension_semantics<parallel>, #tpu.dimension_semantics<arbitrary>], iteration_bounds = array<i64: 1, 1, 1>, scalar_prefetch = 0 : i64, scratch_operands = 1 : i64, tpu.core_type = #tpu.core_type<tc>, window_params = [{transform_indices = @transform_0, window_bounds = array<i64: 16, 32>}, {transform_indices = @transform_1, window_bounds = array<i64: 32, 32>}, {transform_indices = @transform_2, window_bounds = array<i64: 16, 32>}]} {
    %c0_i32 = arith.constant 0 : i32
    %0 = arith.cmpi eq, %arg2, %c0_i32 : i32
    %1 = arith.extui %0 : i1 to i32
    %c0_i32_0 = arith.constant 0 : i32
    %2 = arith.cmpi ne, %1, %c0_i32_0 : i32
    scf.if %2 {
      %cst_10 = arith.constant 0.000000e+00 : f32
      %12 = vector.broadcast %cst_10 : f32 to vector<16x32xf32>
      %c0_11 = arith.constant 0 : index
      %c0_12 = arith.constant 0 : index
      %13 = vector.load %arg6[%c0_11, %c0_12] : memref<16x32xf32, #tpu.memory_space<vmem>>, vector<16x32xf32>
      tpu.vector_store %arg6[%c0_11, %c0_12], %12 {strides = array<i32>} : memref<16x32xf32, #tpu.memory_space<vmem>>, vector<16x32xf32>,
    } else {
    }
    %c0 = arith.constant 0 : index
    %c0_1 = arith.constant 0 : index
    %3 = vector.load %arg6[%c0, %c0_1] : memref<16x32xf32, #tpu.memory_space<vmem>>, vector<16x32xf32>
    %c0_2 = arith.constant 0 : index
    %c0_3 = arith.constant 0 : index
    %4 = vector.load %arg3[%c0_2, %c0_3] : memref<16x32xf32, #tpu.memory_space<vmem>>, vector<16x32xf32>
    %c0_4 = arith.constant 0 : index
    %c0_5 = arith.constant 0 : index
    %5 = vector.load %arg4[%c0_4, %c0_5] : memref<32x32xf32, #tpu.memory_space<vmem>>, vector<32x32xf32>
    %cst = arith.constant dense<0.000000e+00> : vector<16x32xf32>
    %6 = tpu.matmul %4, %5, %cst {dimension_numbers = #tpu.dot_dimension_numbers<[1], [0], [0], [1], [0, 0, 1, 1], [], []>} : vector<16x32xf32>, vector<32x32xf32>, vector<16x32xf32> -> vector<16x32xf32>
    %7 = arith.addf %3, %6 : vector<16x32xf32>
    %c0_6 = arith.constant 0 : index
    %c0_7 = arith.constant 0 : index
    %8 = vector.load %arg6[%c0_6, %c0_7] : memref<16x32xf32, #tpu.memory_space<vmem>>, vector<16x32xf32>
    tpu.vector_store %arg6[%c0_6, %c0_7], %7 {strides = array<i32>} : memref<16x32xf32, #tpu.memory_space<vmem>>, vector<16x32xf32>,
    %c0_i32_8 = arith.constant 0 : i32
    %9 = arith.cmpi eq, %arg2, %c0_i32_8 : i32
    %10 = arith.extui %9 : i1 to i32
    %c0_i32_9 = arith.constant 0 : i32
    %11 = arith.cmpi ne, %10, %c0_i32_9 : i32
    scf.if %11 {
      %c0_10 = arith.constant 0 : index
      %c0_11 = arith.constant 0 : index
      %12 = vector.load %arg6[%c0_10, %c0_11] : memref<16x32xf32, #tpu.memory_space<vmem>>, vector<16x32xf32>
      %c0_12 = arith.constant 0 : index
      %c0_13 = arith.constant 0 : index
      %13 = vector.load %arg5[%c0_12, %c0_13] : memref<16x32xf32, #tpu.memory_space<vmem>>, vector<16x32xf32>
      tpu.vector_store %arg5[%c0_12, %c0_13], %12 {strides = array<i32>} : memref<16x32xf32, #tpu.memory_space<vmem>>, vector<16x32xf32>,
    } else {
    }
    return
  }
  func.func @transform_0(%arg0: i32, %arg1: i32, %arg2: i32) -> (i32, i32) {
    %c0_i32 = arith.constant 0 : i32
    return %arg0, %arg2 : i32, i32
  }
  func.func @transform_1(%arg0: i32, %arg1: i32, %arg2: i32) -> (i32, i32) {
    %c0_i32 = arith.constant 0 : i32
    return %arg2, %arg1 : i32, i32
  }
  func.func @transform_2(%arg0: i32, %arg1: i32, %arg2: i32) -> (i32, i32) {
    %c0_i32 = arith.constant 0 : i32
    return %arg0, %arg1 : i32, i32
  }
}

</mosaic_0001>

<bundles_post_ra>
// kernel: tpu_custom_call.1
= control target key start
LH: loop header
LB: loop body
LE: loop exit
PB: predicated region body
PF: predicated region fallthrough
CT: control target
= control target key end

     0   :  { %7 = vsyncpa [#allocation4], 0  ;;  %s345_s0 = inlined_call_operand.hbm [shape: f32[16,32], index: 0, kind: input, shape index: {}]   ;;  %s346_s1 = inlined_call_operand.hbm [shape: f32[32,32], index: 1, kind: input, shape index: {}]   ;;  %s347_s2 = inlined_call_operand.hbm [shape: f32[16,32], index: 2, kind: output, shape index: {}]  }
   0x1   :  { %8 = vsyncpa [#allocation7], 0 }
   0x2   :  { %9 = vsyncpa [#allocation5], 0  ;;  %s271_s9 = smov [#allocation3]   ;;  %s199_s13 = scalar_lea.hbm %s345_s0, 256 }
   0x3   :  { %s15_s10 = sshll.u32 %s271_s9, 4  ;;  %p200_p0 = scmp.ne.s32.totalorder %s345_s0, %s199_s13  ;;  %s16_s10 = int_to_ptr.vmem [resolvable:$true] %s15_s10 }
   0x4   :  { %p203_p1 = scmp.lt.u32.totalorder %s199_s13, %s345_s0 }
   0x6   :  { %p205_p2 = pnand %p203_p1, %p200_p0 }
   0x8   :  { %208 = shalt.err (!%p205_p2)
}
   0x9   :  { %s209_s18 = scalar_lea.vmem %s16_s10, 256  ;;  %p214_p4 = scmp.lt.s32.totalorder %s16_s10, %s16_s10 }
   0xa   :  { %p210_p3 = scmp.ne.s32.totalorder %s16_s10, %s209_s18  ;;  %p215_p5 = scmp.lt.s32.totalorder %s209_s18, %s209_s18 }
   0xc   :  { %p216_p6 = por %p215_p5, %p214_p4 }
   0xe   :  { %p217_p7 = pnand %p216_p6, %p210_p3 }
  0x10   :  { %220 = shalt.err (!%p217_p7)
}
  0x11   :  { %s272_s19 = smov 128   ;;  %s273_s20 = smov 8  }
  0x12   :  { %21 = dma.hbm_to_vmem [thread:$0]  %s345_s0, 256, %s16_s10, [#allocation4], %s272_s19, %s272_s19, %s273_s20  }
  0x13   :  { %s274_s23 = smov [#allocation6]   ;;  %s221_s27 = scalar_lea.hbm %s346_s1, 512 }
  0x14   :  { %s27_s24 = sshll.u32 %s274_s23, 4  ;;  %p222_p8 = scmp.ne.s32.totalorder %s346_s1, %s221_s27  ;;  %s28_s24 = int_to_ptr.vmem [resolvable:$true] %s27_s24 }
  0x15   :  { %p225_p9 = scmp.lt.u32.totalorder %s221_s27, %s346_s1 }
  0x17   :  { %p227_p10 = pnand %p225_p9, %p222_p8 }
  0x19   :  { %230 = shalt.err (!%p227_p10)
}
  0x1a   :  { %s231_s4 = scalar_lea.vmem %s28_s24, 512  ;;  %p236_p12 = scmp.lt.s32.totalorder %s28_s24, %s28_s24 }
  0x1b   :  { %p232_p11 = scmp.ne.s32.totalorder %s28_s24, %s231_s4  ;;  %p237_p13 = scmp.lt.s32.totalorder %s231_s4, %s231_s4 }
  0x1d   :  { %p238_p0 = por %p237_p13, %p236_p12 }
  0x1f   :  { %p239_p1 = pnand %p238_p0, %p232_p11 }
  0x21   :  { %242 = shalt.err (!%p239_p1)
}
  0x22   :  { %33 = dma.hbm_to_vmem [thread:$0]  %s346_s1, 512, %s28_s24, [#allocation7], %s272_s19, %s272_s19, %s273_s20  }
  0x23   :  { %265 = dma.done.wait [#allocation4], 256  }
  0x24   :  { %266 = vsyncadd [#allocation4], 4294967040 }
  0x25   :  { %267 = dma.done.wait [#allocation7], 512  }
  0x26   :  { %268 = vsyncadd [#allocation7], 4294966784  ;;  %vm44_vm0 = vcmask 261120   ;;  %v275_v0 = vmov 0.0   ;;  %v51_v1 = vld [vmem:[#allocation6] sm:$0xff]  ;;  %v52_v2 = vld [vmem:[#allocation6 + $0x8] sm:$0xff] }
  0x27   :  { %46 = vst.msk [vmem:[#allocation2 + $0x8] sm:$0xff] %vm44_vm0, %v275_v0  ;;  %45 = vst.msk [vmem:[#allocation2] sm:$0xff] %vm44_vm0, %v275_v0  ;;  %v53_v3 = vld [vmem:[#allocation6 + $0x10] sm:$0xff]  ;;  %v185_v4 = vpack.c.bf16 %v52_v2, %v51_v1  ;;  %v54_v5 = vld [vmem:[#allocation6 + $0x18] sm:$0xff]  ;;  %s276_s1 = smov [#allocation8]  }
  0x28   :  { %v49_v6 = vld [vmem:[#allocation3] sm:$0xff]  ;;  %v189_v7 = vpack.c.bf16 %v54_v5, %v53_v3  ;;  %v50_v8 = vld [vmem:[#allocation3 + $0x8] sm:$0xff]  ;;  %s153_s6 = sshll.u32 %s276_s1, 4  ;;  %s154_s6 = int_to_ptr.vmem [resolvable:$true] %s153_s6 }
  0x29   :  { %182 = vmatprep.mubr.msk.f32.mxu0 %vm44_vm0, %v49_v6  ;;  %186 = vmatprep.subr.bf16.mxu0 %v185_v4  ;;  %s243_s7 = scalar_lea.vmem %s154_s6, 256  ;;  %p248_p3 = scmp.lt.s32.totalorder %s154_s6, %s154_s6 }
  0x2a   :  { %188 = vmatpush3.bf16.msra.mxu0 %v185_v4  ;;  %p244_p2 = scmp.ne.s32.totalorder %s154_s6, %s243_s7  ;;  %p249_p4 = scmp.lt.s32.totalorder %s243_s7, %s243_s7 }
  0x2b   :  { %190 = vmatprep.subr.bf16.mxu0 %v189_v7 }
  0x2c   :  { %p250_p5 = por %p249_p4, %p248_p3 }
  0x2e   :  { %192 = vmatpush3.bf16.msra.mxu0 %v189_v7  ;;  %v48_v9 = vld [vmem:[#allocation2 + $0x8] sm:$0xff]  ;;  %v47_v10 = vld [vmem:[#allocation2] sm:$0xff]  ;;  %p251_p6 = pnand %p250_p5, %p244_p2 }
  0x31   :  { %183 = vmatmul.mubr.msk.f32.vlgmr.msra.gmra.mrb[0].mxu0 %vm44_vm0, %v50_v8 }
 0x104   :  { %v184_v11 = vpop.f32.mrb[0].mxu0 }
 0x105   :  { %v138_v12 = vadd.f32 %v184_v11, %v48_v9  ;;  %v128_v13 = vpop.f32.mrb[1].mxu0 }
 0x106   :  { %v137_v14 = vadd.f32 %v128_v13, %v47_v10 }
 0x107   :  { %140 = vst.msk [vmem:[#allocation2 + $0x8] sm:$0xff] %vm44_vm0, %v138_v12 }
 0x108   :  { %139 = vst.msk [vmem:[#allocation2] sm:$0xff] %vm44_vm0, %v137_v14 }
 0x10e   :  { %v145_v15 = vld [vmem:[#allocation2 + $0x8] sm:$0xff] }
 0x10f   :  { %v144_v16 = vld [vmem:[#allocation2] sm:$0xff]  ;;  %147 = vst.msk [vmem:[#allocation8 + $0x8] sm:$0xff] %vm44_vm0, %v145_v15 }
 0x110   :  { %146 = vst.msk [vmem:[#allocation8] sm:$0xff] %vm44_vm0, %v144_v16 }
 0x111   :  { %254 = shalt.err (!%p251_p6)
}
 0x112   :  { %s255_s10 = scalar_lea.hbm %s347_s2, 256 }
 0x113   :  { %p256_p7 = scmp.ne.s32.totalorder %s347_s2, %s255_s10  ;;  %p259_p8 = scmp.lt.u32.totalorder %s255_s10, %s347_s2 }
 0x115   :  { %p261_p9 = pnand %p259_p8, %p256_p7 }
 0x117   :  { %264 = shalt.err (!%p261_p9)
}
 0x118   :  { %159 = dma.vmem_to_hbm [thread:$0]  %s154_s6, 256, %s347_s2, [#allocation5], %s272_s19, %s272_s19, %s273_s20  }
 0x119   :  { %269 = dma.done.wait [#allocation5], 256  }
 0x11a   :  { %270 = vsyncadd [#allocation5], 4294967040 }
 0x11b   :  { %163 = vsyncpa [#allocation4], 1 }
 0x11c   :  { %164 = vsyncpa [#allocation7], 1 }
 0x11d   :  { %165 = vsyncpa [#allocation5], 1 }

</bundles_post_ra>
